<compile_context>
chip_gen: v6e
topology: v6e:2x2x1
jax: 0.10.0
libtpu: 0.0.40
codegen_flags: <defaults>
</compile_context>

<pallas_src>
import functools

import jax
import jax.numpy as jnp
from jax.experimental import pallas as pl
from jax.experimental.pallas import tpu as pltpu

IN_F = 3      # fc1 in_features
HID = 20      # fc1 out_features / fc3 in_features
OUT_F = 1     # fc3 out_features

# Packed parameter slab layout, shape (HID, 8):
#   cols 0..2 : w1 rows (w1[j, k] = weight of hidden unit j, input feature k)
#   col  3    : b1
#   col  4    : w2 (fc3 weight, one per hidden unit)
#   col  5    : b2 (only element [0, 5] is meaningful)
_SLAB_COLS = 8


def _round_up(x, m):
    return ((x + m - 1) // m) * m


def _mlp_kernel(p_ref, x_ref, o_ref, *, compute_dtype):
    """One batch tile of Net.forward, batch on the lane axis.

    p_ref : (HID, 8)  packed f32 parameters (VMEM-resident across the grid)
    x_ref : (3, TB)   lane-major input tile (storage dtype, e.g. bf16)
    o_ref : (1, TB)   lane-dense f32 output tile
    """
    p = p_ref[...]                                   # tiny tile, load once
    x = x_ref[...].astype(compute_dtype)             # (3, TB)

    w1 = p[:, 0:IN_F].astype(compute_dtype)          # (HID, 3)
    b1 = p[:, IN_F:IN_F + 1].astype(compute_dtype)   # (HID, 1)
    w2 = p[:, IN_F + 1:IN_F + 2]                     # (HID, 1) f32
    b2 = p[0:1, IN_F + 2:IN_F + 3]                   # (1, 1)   f32

    # fc1: three broadcasted vector FMAs on the VPU (contraction is far too
    # small for the MXU; push/drain latency would dominate there).
    h = b1                                           # broadcasts to (HID, TB)
    for k in range(IN_F):                            # tiny fixed count, unrolled
        h = h + w1[:, k:k + 1] * x[k:k + 1, :]
    h = jnp.tanh(h)                                  # EUP (bf16-capable on v6e/v7x)

    # fc3: weighted sum over the HID rows, accumulated in f32 (VPU + sublane
    # reduce on the XLU), then the f32 bias.
    y = jnp.sum(w2 * h.astype(jnp.float32), axis=0, keepdims=True) + b2
    o_ref[...] = y.astype(o_ref.dtype)


def net_forward_lane_major(xt, w1, b1, w2, b2, *, batch_tile=65536,
                           compute_dtype=None):
    """Core entry point: feature-major contract, no layout round trips.

    xt: (3, B)  input with batch on the last axis (bf16 recommended on
                v6e/v7x; bf16 storage + compute_dtype=f32 on v5e).
    returns (1, B) float32.
    """
    B = xt.shape[1]
    if compute_dtype is None:
        compute_dtype = xt.dtype

    # --- batch tile: lane-dense (multiple of 128), big enough to amortize the
    # ~0.35us per-grid-step overhead (>= MiB-scale DMAs for large batches). ---
    tb = min(int(batch_tile), _round_up(B, 128))
    tb = _round_up(tb, 128)
    # A single tile cannot shard across v7x's two TensorCores: split it.
    if B <= tb and tb >= 256:
        tb = _round_up(tb // 2, 128)
    padded_b = _round_up(B, tb)
    num_tiles = padded_b // tb

    if padded_b != B:
        xt = jnp.pad(xt, ((0, 0), (0, padded_b - B)))

    # --- pack the 4 tiny parameter arrays into one slab (1 DMA, 1 VMEM tile,
    # constant index_map -> resident across all grid steps). -------------------
    slab = jnp.zeros((HID, _SLAB_COLS), jnp.float32)
    slab = slab.at[:, 0:IN_F].set(w1.T.astype(jnp.float32))            # (20,3)
    slab = slab.at[:, IN_F].set(b1.reshape(-1).astype(jnp.float32))    # (20,)
    slab = slab.at[:, IN_F + 1].set(w2.reshape(-1).astype(jnp.float32))
    slab = slab.at[0, IN_F + 2].set(b2.reshape(()).astype(jnp.float32))

    itemsize = jnp.dtype(xt.dtype).itemsize
    cost = pl.CostEstimate(
        flops=160 * padded_b,                    # fc1 (120) + fc3 (40) per sample
        transcendentals=HID * padded_b,          # tanh per hidden unit
        bytes_accessed=(IN_F * padded_b * itemsize
                        + OUT_F * padded_b * 4
                        + HID * _SLAB_COLS * 4),
    )

    out = pl.pallas_call(
        functools.partial(_mlp_kernel, compute_dtype=compute_dtype),
        out_shape=jax.ShapeDtypeStruct((OUT_F, padded_b), jnp.float32),
        grid=(num_tiles,),
        in_specs=[
            # constant index_map -> slab stays VMEM-resident across grid steps
            pl.BlockSpec((HID, _SLAB_COLS), lambda i: (0, 0)),
            pl.BlockSpec((IN_F, tb), lambda i: (0, i)),
        ],
        out_specs=pl.BlockSpec((OUT_F, tb), lambda i: (0, i)),
        compiler_params=pltpu.CompilerParams(
            dimension_semantics=("parallel",),     # shards batch across TCs (v7x)
            vmem_limit_bytes=48 * 1024 * 1024,     # > v5e 16 MiB default, < v7x 64 MiB
        ),
        cost_estimate=cost,
    )(slab, xt)

    return out[:, :B]


def net_forward(x, w1, b1, w2, b2, *, batch_tile=65536,
                storage_dtype=jnp.bfloat16, compute_dtype=jnp.bfloat16):
    """PyTorch-layout convenience wrapper: x (B, 3) -> (B, 1) float32.

    storage_dtype: dtype x crosses the custom-call boundary in (bf16 halves
                   the dominant HBM stream on every generation).
    compute_dtype: in-kernel fc1 + tanh dtype (bf16 on v6e/v7x, f32 on v5e).
    The fc3 accumulation and the output are always f32.
    """
    # Transpose + cast in one wrapper copy; padding happens inside the
    # lane-major entry point.  Callers that already hold feature-major data
    # should use net_forward_lane_major directly and skip this copy.
    xt = x.T.astype(storage_dtype)
    y = net_forward_lane_major(xt, w1, b1, w2, b2,
                               batch_tile=batch_tile,
                               compute_dtype=compute_dtype)
    return y.T                                       # (B, 1) float32


def init_params(key):
    """Deterministic init mimicking torch.nn.Linear default U(-1/sqrt(fan_in), +)."""
    k1, k2, k3, k4 = jax.random.split(key, 4)

    def uniform(k, shape, fan_in):
        bound = 1.0 / jnp.sqrt(jnp.float32(fan_in))
        return jax.random.uniform(k, shape, jnp.float32, -bound, bound)

    # Stored as (in_features, out_features) so the reference computes x @ W.
    w1 = uniform(k1, (IN_F, HID), IN_F)
    b1 = uniform(k2, (1, HID), IN_F)
    w2 = uniform(k3, (HID, OUT_F), HID)
    b2 = uniform(k4, (1, OUT_F), HID)
    return w1, b1, w2, b2


def reference_forward(x, w1, b1, w2, b2):
    h = jnp.tanh(x @ w1 + b1)
    return h @ w2 + b2


if __name__ == "__main__":
    key = jax.random.PRNGKey(0)
    k_params, k_x1, k_x2 = jax.random.split(key, 3)

    w1, b1, w2, b2 = init_params(k_params)

    # 1) tiny batch, exact f32 storage + compute path (v5e-style): must match
    #    the plain-JAX reference tightly.
    B1 = 8
    x1 = jax.random.normal(k_x1, (B1, IN_F), jnp.float32)
    y1 = jax.block_until_ready(
        net_forward(x1, w1, b1, w2, b2,
                    storage_dtype=jnp.float32, compute_dtype=jnp.float32))
    y1_ref = reference_forward(x1, w1, b1, w2, b2)
    assert y1.shape == (B1, OUT_F)
    assert jnp.allclose(y1, y1_ref, atol=1e-5, rtol=1e-5)

    # 2) multi-tile grid (2 grid steps) with the default bf16 storage/compute
    #    path (v6e/v7x default); fc3 + output stay f32, so tolerance ~1e-2.
    B2 = 1000
    x2 = jax.random.normal(k_x2, (B2, IN_F), jnp.float32)
    y2 = jax.block_until_ready(net_forward(x2, w1, b1, w2, b2))
    y2_ref = reference_forward(x2, w1, b1, w2, b2)
    assert y2.shape == (B2, OUT_F)
    assert jnp.allclose(y2, y2_ref, atol=5e-2, rtol=5e-2)

    print("KERNEL_OK")
</pallas_src>

<mosaic_0001>
module attributes {stable_mosaic.version = 11 : i64} {
  func.func @_mlp_kernel(%arg0: i32, %arg1: memref<20x8xf32, #tpu.memory_space<vmem>>, %arg2: memref<3x128xf32, #tpu.memory_space<vmem>>, %arg3: memref<1x128xf32, #tpu.memory_space<vmem>>) attributes {dimension_semantics = [#tpu.dimension_semantics<parallel>], iteration_bounds = array<i64: 1>, scalar_prefetch = 0 : i64, scratch_operands = 0 : i64, tpu.core_type = #tpu.core_type<tc>, window_params = [{pipeline_mode = #tpu.pipeline_mode<synchronous>, transform_indices = @transform_0, window_bounds = array<i64: 20, 8>}, {transform_indices = @transform_1, window_bounds = array<i64: 3, 128>}, {transform_indices = @transform_2, window_bounds = array<i64: 1, 128>}]} {
    %c0 = arith.constant 0 : index
    %c0_0 = arith.constant 0 : index
    %0 = vector.load %arg1[%c0, %c0_0] : memref<20x8xf32, #tpu.memory_space<vmem>>, vector<20x8xf32>
    %c0_1 = arith.constant 0 : index
    %c0_2 = arith.constant 0 : index
    %1 = vector.load %arg2[%c0_1, %c0_2] : memref<3x128xf32, #tpu.memory_space<vmem>>, vector<3x128xf32>
    %2 = vector.extract_strided_slice %0 {offsets = [0, 0], sizes = [20, 3], strides = [1, 1]} : vector<20x8xf32> to vector<20x3xf32>
    %3 = vector.extract_strided_slice %0 {offsets = [0, 3], sizes = [20, 1], strides = [1, 1]} : vector<20x8xf32> to vector<20x1xf32>
    %4 = vector.extract_strided_slice %0 {offsets = [0, 4], sizes = [20, 1], strides = [1, 1]} : vector<20x8xf32> to vector<20x1xf32>
    %5 = vector.extract_strided_slice %0 {offsets = [0, 5], sizes = [1, 1], strides = [1, 1]} : vector<20x8xf32> to vector<1x1xf32>
    %6 = vector.extract_strided_slice %2 {offsets = [0, 0], sizes = [20, 1], strides = [1, 1]} : vector<20x3xf32> to vector<20x1xf32>
    %7 = vector.extract_strided_slice %1 {offsets = [0, 0], sizes = [1, 128], strides = [1, 1]} : vector<3x128xf32> to vector<1x128xf32>
    %8 = vector.broadcast %6 : vector<20x1xf32> to vector<20x128xf32>
    %9 = vector.broadcast %7 : vector<1x128xf32> to vector<20x128xf32>
    %10 = arith.mulf %8, %9 : vector<20x128xf32>
    %11 = vector.broadcast %3 : vector<20x1xf32> to vector<20x128xf32>
    %12 = arith.addf %11, %10 : vector<20x128xf32>
    %13 = vector.extract_strided_slice %2 {offsets = [0, 1], sizes = [20, 1], strides = [1, 1]} : vector<20x3xf32> to vector<20x1xf32>
    %14 = vector.extract_strided_slice %1 {offsets = [1, 0], sizes = [1, 128], strides = [1, 1]} : vector<3x128xf32> to vector<1x128xf32>
    %15 = vector.broadcast %13 : vector<20x1xf32> to vector<20x128xf32>
    %16 = vector.broadcast %14 : vector<1x128xf32> to vector<20x128xf32>
    %17 = arith.mulf %15, %16 : vector<20x128xf32>
    %18 = arith.addf %12, %17 : vector<20x128xf32>
    %19 = vector.extract_strided_slice %2 {offsets = [0, 2], sizes = [20, 1], strides = [1, 1]} : vector<20x3xf32> to vector<20x1xf32>
    %20 = vector.extract_strided_slice %1 {offsets = [2, 0], sizes = [1, 128], strides = [1, 1]} : vector<3x128xf32> to vector<1x128xf32>
    %21 = vector.broadcast %19 : vector<20x1xf32> to vector<20x128xf32>
    %22 = vector.broadcast %20 : vector<1x128xf32> to vector<20x128xf32>
    %23 = arith.mulf %21, %22 : vector<20x128xf32>
    %24 = arith.addf %18, %23 : vector<20x128xf32>
    %25 = math.tanh %24 : vector<20x128xf32>
    %26 = vector.broadcast %4 : vector<20x1xf32> to vector<20x128xf32>
    %27 = arith.mulf %26, %25 : vector<20x128xf32>
    %cst = arith.constant dense<0.000000e+00> : vector<128xf32>
    %28 = vector.multi_reduction <add>, %27, %cst [0] : vector<20x128xf32> to vector<128xf32>
    %29 = vector.shape_cast %28 : vector<128xf32> to vector<1x128xf32>
    %30 = vector.broadcast %5 : vector<1x1xf32> to vector<1x128xf32>
    %31 = arith.addf %29, %30 : vector<1x128xf32>
    %c0_3 = arith.constant 0 : index
    %c0_4 = arith.constant 0 : index
    %32 = vector.load %arg3[%c0_3, %c0_4] : memref<1x128xf32, #tpu.memory_space<vmem>>, vector<1x128xf32>
    tpu.vector_store %arg3[%c0_3, %c0_4], %31 {strides = array<i32>} : memref<1x128xf32, #tpu.memory_space<vmem>>, vector<1x128xf32>,
    return
  }
  func.func @transform_0(%arg0: i32) -> (i32, i32) {
    %c0_i32 = arith.constant 0 : i32
    %c0_i32_0 = arith.constant 0 : i32
    %c0_i32_1 = arith.constant 0 : i32
    return %c0_i32, %c0_i32_0 : i32, i32
  }
  func.func @transform_1(%arg0: i32) -> (i32, i32) {
    %c0_i32 = arith.constant 0 : i32
    %c0_i32_0 = arith.constant 0 : i32
    return %c0_i32, %arg0 : i32, i32
  }
  func.func @transform_2(%arg0: i32) -> (i32, i32) {
    %c0_i32 = arith.constant 0 : i32
    %c0_i32_0 = arith.constant 0 : i32
    return %c0_i32, %arg0 : i32, i32
  }
}

</mosaic_0001>

<bundles_post_ra>
// kernel: tpu_custom_call.1
= control target key start
LH: loop header
LB: loop body
LE: loop exit
PB: predicated region body
PF: predicated region fallthrough
CT: control target
= control target key end

     0   :  { %v190_v2 = vmov 0   ;;  %s227_s0 = inlined_call_operand.vmem [shape: f32[20,8], index: 0, kind: input, shape index: {}]   ;;  %s228_s1 = inlined_call_operand.vmem [shape: f32[3,128], index: 1, kind: input, shape index: {}]   ;;  %s229_s2 = inlined_call_operand.hbm [shape: f32[1,128], index: 2, kind: output, shape index: {}]  }
   0x1   :  { %v14_v0 = vld [vmem:[%s227_s0 + $0x10] sm:$0xf]  ;;  %v12_v1 = vld [vmem:[%s227_s0] sm:$0xff]  ;;  %153 = vset.pattern.permute.xlu1 %v190_v2  ;;  %152 = vset.pattern.permute.xlu0 %v190_v2 }
   0x2   :  { %28 = vperm.xlu1 %153, %v14_v0   ;;  %18 = vperm.xlu0 %152, %v12_v1  }
   0x3   :  { %7 = vsyncpa [#allocation3], 0  ;;  %v13_v3 = vld [vmem:[%s227_s0 + $0x8] sm:$0xff]  ;;  %v191_v4 = vmov 3   ;;  %v192_v5 = vmov 1   ;;  %v193_v6 = vmov 2   ;;  %v31_v11 = vlaneseq }
   0x4   :  { %v194_v7 = vmov 4   ;;  %v195_v8 = vmov 5   ;;  %v15_v19 = vld [vmem:[%s228_s1] sm:$0x7]  ;;  %vm116_vm0 = vcmask 1043456   ;;  %s196_s1 = smov [#allocation2]  }
   0x5   :  { %v32_v14 = vshrl.u32 %v31_v11, 7  ;;  %s137_s16 = sshll.u32 %s196_s1, 4  ;;  %s138_s16 = int_to_ptr.vmem [resolvable:$true] %s137_s16 }
   0x6   :  { %154 = vset.pattern.permute.xlu1 %v191_v4  ;;  %23 = vperm.xlu0 %152, %v13_v3   ;;  %s168_s17 = scalar_lea.vmem %s138_s16, 16  ;;  %s172_s18 = scalar_lea.vmem %s138_s16, 32 }
   0x7   :  { %39 = vperm.xlu1 %154, %v12_v1   ;;  %v33_v17 = vsub.s32 0, %v32_v14  ;;  %v67_v18 = vsub.s32 1, %v32_v14  ;;  %v89_v21 = vsub.s32 2, %v32_v14  ;;  %p169_p0 = scmp.ne.s32.totalorder %s138_s16, %s168_s17  ;;  %p173_p1 = scmp.lt.s32.totalorder %s138_s16, %s138_s16 }
   0x8   :  { %p174_p2 = scmp.lt.s32.totalorder %s172_s18, %s168_s17 }
   0x9   :  { %v34_v23 = vrot.slane %v15_v19, %v33_v17  ;;  %v68_v24 = vrot.slane %v15_v19, %v67_v18  ;;  %v90_v26 = vrot.slane %v15_v19, %v89_v21 }
   0xa   :  { %155 = vset.pattern.permute.xlu0 %v191_v4  ;;  %p175_p3 = por %p174_p2, %p173_p1 }
   0xb   :  { %156 = vset.pattern.permute.xlu1 %v192_v5  ;;  %43 = vperm.xlu0 %155, %v13_v3  }
   0xc   :  { %54 = vperm.xlu1 %156, %v12_v1   ;;  %p176_p4 = pnand %p175_p3, %p169_p0 }
   0xf   :  { %47 = vperm.xlu0 %155, %v14_v0  }
  0x10   :  { %58 = vperm.xlu1 %156, %v13_v3  }
  0x13   :  { %157 = vset.pattern.permute.xlu0 %v193_v6 }
  0x14   :  { %62 = vperm.xlu1 %156, %v14_v0   ;;  %76 = vperm.xlu0 %157, %v12_v1  }
  0x18   :  { %158 = vset.pattern.permute.xlu1 %v193_v6  ;;  %159 = vset.pattern.permute.xlu0 %v194_v7 }
  0x19   :  { %80 = vperm.xlu1 %158, %v13_v3   ;;  %101 = vperm.xlu0 %159, %v12_v1  }
  0x1d   :  { %84 = vperm.xlu1 %158, %v14_v0   ;;  %161 = vset.pattern.permute.xlu0 %v195_v8 }
  0x1e   :  { %126 = vperm.xlu0 %161, %v12_v1  }
  0x21   :  { %160 = vset.pattern.permute.xlu1 %v194_v7 }
  0x22   :  { %105 = vperm.xlu1 %160, %v13_v3  }
  0x26   :  { %109 = vperm.xlu1 %160, %v14_v0  }
  0x7d   :  { %v29_v9 = vpop.permute.xlu1 %28  ;;  %v19_v10 = vpop.permute.xlu0 %18 }
  0x7e   :  { %v35_v25 = vmul.f32 %v34_v23, %v19_v10  ;;  %v37_v37 = vmul.f32 %v34_v23, %v29_v9 }
  0x81   :  { %v24_v12 = vpop.permute.xlu0 %23 }
  0x82   :  { %v40_v13 = vpop.permute.xlu1 %39  ;;  %v36_v27 = vmul.f32 %v34_v23, %v24_v12 }
  0x83   :  { %v50_v32 = vadd.f32 %v40_v13, %v35_v25 }
  0x86   :  { %v44_v15 = vpop.permute.xlu0 %43 }
  0x87   :  { %v55_v16 = vpop.permute.xlu1 %54  ;;  %v51_v34 = vadd.f32 %v44_v15, %v36_v27 }
  0x88   :  { %v69_v30 = vmul.f32 %v68_v24, %v55_v16 }
  0x8a   :  { %v48_v20 = vpop.permute.xlu0 %47  ;;  %v72_v35 = vadd.f32 %v69_v30, %v50_v32 }
  0x8b   :  { %v59_v22 = vpop.permute.xlu1 %58  ;;  %v52_v42 = vadd.f32 %v48_v20, %v37_v37 }
  0x8c   :  { %v70_v31 = vmul.f32 %v68_v24, %v59_v22 }
  0x8e   :  { %v73_v38 = vadd.f32 %v70_v31, %v51_v34 }
  0x8f   :  { %v63_v28 = vpop.permute.xlu1 %62  ;;  %v77_v29 = vpop.permute.xlu0 %76 }
  0x90   :  { %v91_v33 = vmul.f32 %v90_v26, %v77_v29  ;;  %v71_v39 = vmul.f32 %v68_v24, %v63_v28 }
  0x92   :  { %v94_v41 = vadd.f32 %v91_v33, %v72_v35  ;;  %v74_v45 = vadd.f32 %v71_v39, %v52_v42 }
  0x94   :  { %v81_v36 = vpop.permute.xlu1 %80  ;;  %v102_v51 = vpop.permute.xlu0 %101 }
  0x95   :  { %v92_v40 = vmul.f32 %v90_v26, %v81_v36 }
  0x97   :  { %v95_v43 = vadd.f32 %v92_v40, %v73_v38 }
  0x98   :  { %v85_v44 = vpop.permute.xlu1 %84 }
  0x99   :  { %162 = vtanh.f32 %v95_v43  ;;  %v93_v46 = vmul.f32 %v90_v26, %v85_v44  ;;  %v127_v1 = vpop.permute.xlu0 %126 }
  0x9a   :  { %164 = vtanh.f32 %v94_v41 }
  0x9b   :  { %v96_v47 = vadd.f32 %v93_v46, %v74_v45 }
  0x9d   :  { %166 = vtanh.f32 %v96_v47  ;;  %v106_v48 = vpop.permute.xlu1 %105 }
  0xa1   :  { %v110_v55 = vpop.permute.xlu1 %109 }
  0xa6   :  { %v163_v49 = vpop.eup %162 }
  0xa7   :  { %v165_v50 = vpop.eup %164  ;;  %v113_v52 = vmul.f32 %v163_v49, %v106_v48 }
  0xa8   :  { %v112_v54 = vmul.f32 %v165_v50, %v102_v51 }
  0xaa   :  { %v167_v53 = vpop.eup %166  ;;  %v115_v57 = vadd.f32 %v113_v52, %v112_v54 }
  0xab   :  { %v114_v56 = vmul.f32 %v167_v53, %v110_v55 }
  0xad   :  { %v117_v58 = vsel %vm116_vm0, %v114_v56, 0.0 }
  0xae   :  { %v118_v59 = vadd.f32 %v117_v58, %v115_v57 }
  0xb0   :  { %v119_v60 = vrot.slane %v118_v59, 4 }
  0xb2   :  { %v120_v61 = vadd.f32 %v119_v60, %v118_v59 }
  0xb4   :  { %v121_v62 = vrot.slane %v120_v61, 2 }
  0xb6   :  { %v122_v63 = vadd.f32 %v121_v62, %v120_v61 }
  0xb8   :  { %v123_v0 = vrot.slane %v122_v63, 1 }
  0xba   :  { %v124_v2 = vadd.f32 %v123_v0, %v122_v63 }
  0xbc   :  { %v129_v3 = vadd.f32 %v127_v1, %v124_v2 }
  0xbe   :  { %130 = vst [vmem:[#allocation2] sm:$0x1] %v129_v3 }
  0xbf   :  { %179 = shalt.err (!%p176_p4)
}
  0xc0   :  { %140 = dma.vmem_to_hbm [thread:$0]  %s138_s16, 16, %s229_s2, [#allocation3]  }
  0xc1   :  { %188 = dma.done.wait [#allocation3], 16  }
  0xc2   :  { %189 = vsyncadd [#allocation3], 4294967280 }
  0xc3   :  { %144 = vsyncpa [#allocation3], 1 }

</bundles_post_ra>
